<compile_context>
chip_gen: v6e
topology: v6e:2x2x1
jax: 0.10.0
libtpu: 0.0.40
codegen_flags: <defaults>
</compile_context>

<pallas_src>
import functools

import jax
import jax.numpy as jnp
from jax.experimental import pallas as pl
from jax.experimental.pallas import tpu as pltpu

BN_EPS = 1e-5
LN_EPS = 1e-5


# --------------------------------------------------------------------------- helpers
def _round_up(x, m):
    return (x + m - 1) // m * m


def _pad_axis(a, axis, size):
    if a.shape[axis] >= size:
        return a
    widths = [(0, 0)] * a.ndim
    widths[axis] = (0, size - a.shape[axis])
    return jnp.pad(a, widths)


@functools.lru_cache(maxsize=1)
def _num_tensorcores():
    """TensorCores per device (device_kind heuristic; v7x/v4/v5p-class expose 2)."""
    try:
        kind = jax.devices()[0].device_kind.lower()
    except Exception:
        return 1
    return 2 if any(t in kind for t in ("v7", "v4", "v5p")) else 1


@functools.lru_cache(maxsize=1)
def _vmem_limit_bytes():
    """Scoped-VMEM cap with headroom: 3/4 of physical, never the full 64 MiB on v7x."""
    try:
        phys = int(pltpu.get_tpu_info().vmem_capacity_bytes)
        return min(phys * 3 // 4, 96 * 1024 * 1024)
    except Exception:
        return 48 * 1024 * 1024


def _pick_block(batch, block_b=None):
    """Batch tile (multiple of 16 for bf16 sublane packing) + padded batch it divides.
    Only force >=2 grid steps when there are >=2 TensorCores to run them on; on single-TC
    v5e/v6e one big tile avoids halving the matmul M and the ~0.35us/step pipeline cost."""
    n_tc = _num_tensorcores()
    if block_b is None:
        block_b = 256 if n_tc > 1 else 512
    block_b = _round_up(max(block_b, 16), 16)
    bb = min(block_b, _round_up(batch, 16))
    if n_tc > 1:
        bp16 = _round_up(batch, 16)
        if _round_up(batch, bb) // bb < 2 and bp16 >= 32:
            bb = _round_up(bp16 // 2, 16)
    return bb, _round_up(batch, bb)


def _fold_bn(g, b, m, v, eps=BN_EPS):
    scale = g / jnp.sqrt(v + eps)
    return scale, b - m * scale


def _compiler_params():
    return pltpu.CompilerParams(dimension_semantics=("parallel",),
                                vmem_limit_bytes=_vmem_limit_bytes())


@functools.lru_cache(maxsize=1)
def _roll_matches_jnp():
    """True if pltpu.roll follows jnp.roll semantics (out[i] = x[i - shift]); used once to
    orient the pooling edge masks so max/avg-pool edges are exact either way."""
    def k(x_ref, o_ref):
        o_ref[...] = pltpu.roll(x_ref[...], 1, 1)
    x = jax.lax.broadcasted_iota(jnp.float32, (8, 128), 1)
    out = pl.pallas_call(k, out_shape=jax.ShapeDtypeStruct((8, 128), jnp.float32))(x)
    return bool(out[0, 1] == 0.0)


def _pool_edge_masks(dh):
    """(8, dh) f32 resident input: rows 0/1 additive (-inf at the non-existent neighbour) for
    the max-pool rolled terms, rows 2/3 multiplicative (0 at that edge) for the avg-pool."""
    col = jnp.arange(dh)
    neg_inf = jnp.float32(-jnp.inf)
    add_first = jnp.where(col == 0, neg_inf, 0.0).astype(jnp.float32)
    add_last = jnp.where(col == dh - 1, neg_inf, 0.0).astype(jnp.float32)
    mul_first = jnp.where(col == 0, 0.0, 1.0).astype(jnp.float32)
    mul_last = jnp.where(col == dh - 1, 0.0, 1.0).astype(jnp.float32)
    if _roll_matches_jnp():          # roll(h, 1) holds h[:, j-1]  (wraps at column 0)
        rows = [add_first, add_last, mul_first, mul_last]
    else:                            # roll(h, 1) holds h[:, j+1]  (wraps at column dh-1)
        rows = [add_last, add_first, mul_last, mul_first]
    return jnp.concatenate([jnp.stack(rows), jnp.zeros((4, dh), jnp.float32)], axis=0)


# --------------------------------------------------------------------------- kernels
def _linear_bn_swish_kernel(x_ref, w_ref, b_ref, o_ref):
    # bf16 x @ bf16 W on the MXU (f32 accumulate); W carries the folded BN scale, b the shift.
    h = jnp.dot(x_ref[...], w_ref[...], preferred_element_type=jnp.float32) + b_ref[...]
    o_ref[...] = (h * jax.nn.sigmoid(h)).astype(o_ref.dtype)      # MemoryEfficientSwish


def _gate_head_kernel(x_ref, g1_ref, b1_ref, g2_ref, b2_ref,
                      w3_ref, b3_ref, wa_ref, wb_ref, wc_ref, bh_ref, m_ref,
                      o_ref):
    # Attention gate -> dense3 -> max/avg pool (k=3,s=1,p=1) -> merged dense4|dense5, fused.
    # All matmuls bf16 x bf16 -> f32 (native MXU); elementwise math in f32 (VPU).
    x_bf = x_ref[...]                                     # bf16
    x = x_bf.astype(jnp.float32)

    a = jnp.dot(x_bf, g1_ref[...], preferred_element_type=jnp.float32) + b1_ref[...]
    a = a * jax.nn.sigmoid(a)                             # Swish
    y = jnp.dot(a.astype(jnp.bfloat16), g2_ref[...],
                preferred_element_type=jnp.float32) + b2_ref[...]
    g = x * jax.nn.sigmoid(y)                             # gated activation, f32

    h = jnp.dot(g.astype(jnp.bfloat16), w3_ref[...],
                preferred_element_type=jnp.float32) + b3_ref[...]

    # Shift-by-one views via the XLU (no VMEM scratch, no misaligned lane slices); the wrapped
    # edge column of each rotation is neutralised by the precomputed masks in m_ref.
    dh = h.shape[-1]
    r_fwd = pltpu.roll(h, 1, 1)                           # neighbour on one side
    r_bwd = pltpu.roll(h, dh - 1, 1)                      # neighbour on the other side
    masks = m_ref[...]
    yy = jnp.maximum(h, jnp.maximum(r_fwd + masks[0:1, :], r_bwd + masks[1:2, :]))
    zz = (r_fwd * masks[2:3, :] + h + r_bwd * masks[3:4, :]) * (1.0 / 3.0)

    # cat([yy, zz, h]) @ [W4 | W5]  ==  yy@Wa + zz@Wb + h@Wc, with Wa/Wb/Wc lane-concatenated
    # over the two heads so dense4 and dense5 share one 768-wide output pass (3 dots, not 6).
    o = (jnp.dot(yy.astype(jnp.bfloat16), wa_ref[...], preferred_element_type=jnp.float32)
         + jnp.dot(zz.astype(jnp.bfloat16), wb_ref[...], preferred_element_type=jnp.float32)
         + jnp.dot(h.astype(jnp.bfloat16), wc_ref[...], preferred_element_type=jnp.float32)
         + bh_ref[...])
    o_ref[...] = o.astype(o_ref.dtype)


# --------------------------------------------------------------------------- wrappers
def linear_bn_swish(x, w, b, *, block_b=None):
    """Fused (x @ w + b) -> Swish over a batch-parallel grid.  x/w bf16, b f32, out bf16."""
    batch, k = x.shape
    n = w.shape[1]
    bb, bp = _pick_block(batch, block_b)
    xp = _pad_axis(x, 0, bp)
    resident = lambda i: (0, 0)
    out = pl.pallas_call(
        _linear_bn_swish_kernel,
        out_shape=jax.ShapeDtypeStruct((bp, n), jnp.bfloat16),
        grid_spec=pltpu.PrefetchScalarGridSpec(
            num_scalar_prefetch=0,
            grid=(bp // bb,),
            in_specs=[
                pl.BlockSpec((bb, k), lambda i: (i, 0)),
                pl.BlockSpec((k, n), resident),           # folded weight, resident
                pl.BlockSpec((1, n), resident),
            ],
            out_specs=pl.BlockSpec((bb, n), lambda i: (i, 0)),
        ),
        compiler_params=_compiler_params(),
    )(xp, w, b)
    return out[:batch]


def gate_head(x, g1, b1, g2, b2, w3, b3, wa, wb, wc, bh, masks, *, block_b=None):
    """Fused attention gate + dense3 + pools + merged dense4/dense5 head (single pallas_call)."""
    batch, d = x.shape
    hdim = g1.shape[1]
    t = wa.shape[1]
    bb, bp = _pick_block(batch, block_b)
    xp = _pad_axis(x, 0, bp)
    resident = lambda i: (0, 0)
    # NOTE: resident bf16 weights total ~3 MiB (~6 MiB double-buffered), far below the VMEM
    # cap on every generation incl. v7x, so pl.Buffered(1) is not needed at these sizes.
    out = pl.pallas_call(
        _gate_head_kernel,
        out_shape=jax.ShapeDtypeStruct((bp, t), jnp.float32),
        grid_spec=pltpu.PrefetchScalarGridSpec(
            num_scalar_prefetch=0,
            grid=(bp // bb,),
            in_specs=[
                pl.BlockSpec((bb, d), lambda i: (i, 0)),
                pl.BlockSpec((d, hdim), resident),
                pl.BlockSpec((1, hdim), resident),
                pl.BlockSpec((hdim, d), resident),
                pl.BlockSpec((1, d), resident),
                pl.BlockSpec((d, d), resident),
                pl.BlockSpec((1, d), resident),
                pl.BlockSpec((d, t), resident),
                pl.BlockSpec((d, t), resident),
                pl.BlockSpec((d, t), resident),
                pl.BlockSpec((1, t), resident),
                pl.BlockSpec((8, d), resident),           # pooling edge masks
            ],
            out_specs=pl.BlockSpec((bb, t), lambda i: (i, 0)),
        ),
        compiler_params=_compiler_params(),
    )(xp, g1, b1, g2, b2, w3, b3, wa, wb, wc, bh, masks)
    return out[:batch]


# --------------------------------------------------------------------------- transformer (plain JAX)
def _layer_norm(x, w, b, eps=LN_EPS):
    mu = jnp.mean(x, axis=-1, keepdims=True)
    var = jnp.mean(jnp.square(x - mu), axis=-1, keepdims=True)
    return (x - mu) * jax.lax.rsqrt(var + eps) * w + b


def _mha(x, p, num_heads):
    s, e = x.shape
    hd = e // num_heads
    qkv = x @ p["in_w"].T + p["in_b"]
    q, k, v = jnp.split(qkv, 3, axis=-1)
    split_heads = lambda t: t.reshape(s, num_heads, hd).transpose(1, 0, 2)
    q, k, v = split_heads(q), split_heads(k), split_heads(v)
    logits = jnp.einsum("hqd,hkd->hqk", q, k) / (hd ** 0.5)
    attn = jax.nn.softmax(logits, axis=-1)
    o = jnp.einsum("hqk,hkd->hqd", attn, v).transpose(1, 0, 2).reshape(s, e)
    return o @ p["out_w"].T + p["out_b"]


def _encoder_layer(x, p, num_heads=32):
    # nn.TransformerEncoderLayer, eval mode (dropout = identity), post-norm, ReLU FFN.
    # The PyTorch model feeds (batch, 1, 512) with batch_first=False, i.e. seq = batch and
    # batch = 1, so attention runs across the batch; x here is (batch, 512).
    # TODO(synk): kept as plain JAX/XLA -- 32 heads of dim 16 over a seq of length `batch`
    #             has no clean/worthwhile Pallas mapping at these shapes.
    x = x.astype(jnp.float32)
    x = _layer_norm(x + _mha(x, p, num_heads), p["ln1_w"], p["ln1_b"])
    ff = jnp.maximum(x @ p["ff1_w"].T + p["ff1_b"], 0.0) @ p["ff2_w"].T + p["ff2_b"]
    return _layer_norm(x + ff, p["ln2_w"], p["ln2_b"])


# --------------------------------------------------------------------------- full forward
def transformer_net_forward(x, params, *, block_b=None):
    """Inference forward of TransformerNet; returns (targets, extra_targets)."""
    # TODO(synk): training-mode BatchNorm (batch statistics + running-stat updates) and
    #             Dropout RNG are not reproduced; this is the eval-mode forward.
    e = params["w1"].shape[0]
    bf = jnp.bfloat16

    # ---- bn_init + dense1 (Linear no-bias + BN + Swish); both BNs folded into W/b ----
    s0, t0 = _fold_bn(**params["bn0"])
    s1, t1 = _fold_bn(**params["bn1"])
    w1 = params["w1"].T                                    # (F, E)
    w_eff = (s0[:, None] * w1) * s1[None, :]
    b_eff = (t0 @ w1) * s1 + t1
    f_pad = _round_up(x.shape[1], 128)                     # 875 -> 896 (lane-dense K)
    h = linear_bn_swish(_pad_axis(x, 1, f_pad).astype(bf),
                        _pad_axis(w_eff, 0, f_pad).astype(bf),
                        b_eff[None, :].astype(jnp.float32),
                        block_b=block_b)

    # ---- 2x TransformerEncoderLayer (plain JAX/XLA, f32 math, bf16 at kernel boundaries) ----
    h = _encoder_layer(h, params["trans"][0])
    h = _encoder_layer(h, params["trans"][1])

    # ---- fused attention gate + dense3 + pools + merged dense4/dense5 head (Pallas) ----
    sa1, ta1 = _fold_bn(**params["att_bn1"])
    sa2, ta2 = _fold_bn(**params["att_bn2"])
    g1 = params["att_w1"].T * sa1[None, :]                 # (E, E//4), BN scale folded
    g2 = params["att_w2"].T * sa2[None, :]                 # (E//4, E)
    h_pad = _round_up(g1.shape[1], 128)                    # attention hidden (128 already)
    g1 = _pad_axis(g1, 1, h_pad)
    g2 = _pad_axis(g2, 0, h_pad)
    ta1 = _pad_axis(ta1, 0, h_pad)                         # padded units: swish(0)=0 -> inert

    t1_dim = params["w4"].shape[0]
    t2_dim = params["w5"].shape[0]
    t1_pad = _round_up(t1_dim, 128)                        # 206 -> 256 (lane-dense output)
    t2_pad = _round_up(t2_dim, 128)                        # 402 -> 512
    w4 = _pad_axis(params["w4"].T, 1, t1_pad)              # (3E, T1p)
    w5 = _pad_axis(params["w5"].T, 1, t2_pad)              # (3E, T2p)
    wa = jnp.concatenate([w4[:e], w5[:e]], axis=1)         # yy rows, (E, T1p+T2p)
    wb = jnp.concatenate([w4[e:2 * e], w5[e:2 * e]], axis=1)   # zz rows
    wc = jnp.concatenate([w4[2 * e:], w5[2 * e:]], axis=1)     # h  rows
    bh = jnp.concatenate([_pad_axis(params["b4"], 0, t1_pad),
                          _pad_axis(params["b5"], 0, t2_pad)])
    masks = _pool_edge_masks(e)

    o = gate_head(h.astype(bf),
                  g1.astype(bf), ta1[None, :].astype(jnp.float32),
                  g2.astype(bf), ta2[None, :].astype(jnp.float32),
                  params["w3"].T.astype(bf), params["b3"][None, :].astype(jnp.float32),
                  wa.astype(bf), wb.astype(bf), wc.astype(bf),
                  bh[None, :].astype(jnp.float32), masks,
                  block_b=block_b)
    return o[:, :t1_dim], o[:, t1_pad:t1_pad + t2_dim]


# --------------------------------------------------------------------------- reference (f32)
def reference_forward(x, params):
    def bn(h, p):
        return (h - p["m"]) / jnp.sqrt(p["v"] + BN_EPS) * p["g"] + p["b"]

    h = bn(x, params["bn0"])
    h = h @ params["w1"].T
    h = bn(h, params["bn1"])
    h = h * jax.nn.sigmoid(h)                              # Swish; Dropout identity in eval
    h = _encoder_layer(h, params["trans"][0])
    h = _encoder_layer(h, params["trans"][1])
    a = h @ params["att_w1"].T
    a = bn(a, params["att_bn1"])
    a = a * jax.nn.sigmoid(a)
    a = a @ params["att_w2"].T
    a = bn(a, params["att_bn2"])
    h = h * jax.nn.sigmoid(a)
    h = h @ params["w3"].T + params["b3"]
    ninf = jnp.pad(h, ((0, 0), (1, 1)), constant_values=-jnp.inf)
    yy = jnp.maximum(jnp.maximum(ninf[:, :-2], ninf[:, 1:-1]), ninf[:, 2:])
    zpad = jnp.pad(h, ((0, 0), (1, 1)))
    zz = (zpad[:, :-2] + zpad[:, 1:-1] + zpad[:, 2:]) / 3.0
    cat = jnp.concatenate([yy, zz, h], axis=1)
    return cat @ params["w4"].T + params["b4"], cat @ params["w5"].T + params["b5"]


# --------------------------------------------------------------------------- params / demo
def init_params(key, num_features=875, hidden=512, num_targets=206,
                num_extra_targets=402, ffn=2048):
    keys = iter(jax.random.split(key, 96))

    def rnd(shape, scale):
        return scale * jax.random.normal(next(keys), shape, dtype=jnp.float32)

    def bn(n):
        return dict(g=1.0 + rnd((n,), 0.1), b=rnd((n,), 0.1),
                    m=rnd((n,), 0.1), v=1.0 + jnp.abs(rnd((n,), 0.2)))

    def enc(e, f):
        return dict(in_w=rnd((3 * e, e), e ** -0.5), in_b=rnd((3 * e,), 0.02),
                    out_w=rnd((e, e), e ** -0.5), out_b=rnd((e,), 0.02),
                    ln1_w=1.0 + rnd((e,), 0.05), ln1_b=rnd((e,), 0.02),
                    ff1_w=rnd((f, e), e ** -0.5), ff1_b=rnd((f,), 0.02),
                    ff2_w=rnd((e, f), f ** -0.5), ff2_b=rnd((e,), 0.02),
                    ln2_w=1.0 + rnd((e,), 0.05), ln2_b=rnd((e,), 0.02))

    return dict(
        bn0=bn(num_features),
        w1=rnd((hidden, num_features), num_features ** -0.5), bn1=bn(hidden),
        trans=[enc(hidden, ffn), enc(hidden, ffn)],
        att_w1=rnd((hidden // 4, hidden), hidden ** -0.5), att_bn1=bn(hidden // 4),
        att_w2=rnd((hidden, hidden // 4), (hidden // 4) ** -0.5), att_bn2=bn(hidden),
        w3=rnd((hidden, hidden), hidden ** -0.5), b3=rnd((hidden,), 0.02),
        w4=rnd((num_targets, 3 * hidden), (3 * hidden) ** -0.5), b4=rnd((num_targets,), 0.02),
        w5=rnd((num_extra_targets, 3 * hidden), (3 * hidden) ** -0.5),
        b5=rnd((num_extra_targets,), 0.02),
    )


if __name__ == "__main__":
    key = jax.random.PRNGKey(0)
    kp, kx = jax.random.split(key)
    params = init_params(kp)

    batch = 16                                   # the transformer attends across the batch
    x = jax.random.normal(kx, (batch, 875), dtype=jnp.float32)

    out_t, out_x = transformer_net_forward(x, params)
    out_t, out_x = jax.block_until_ready((out_t, out_x))

    ref_t, ref_x = reference_forward(x, params)
    assert out_t.shape == (batch, 206) and out_x.shape == (batch, 402)
    # bf16 MXU + bf16 activation storage vs the f32 reference -> relaxed tolerance.
    assert jnp.allclose(out_t, ref_t, atol=6e-2, rtol=6e-2), "dense4 output mismatch"
    assert jnp.allclose(out_x, ref_x, atol=6e-2, rtol=6e-2), "dense5 output mismatch"

    print("KERNEL_OK")
</pallas_src>

<mosaic_0001>
module attributes {stable_mosaic.version = 11 : i64} {
  func.func @_linear_bn_swish_kernel(%arg0: i32, %arg1: memref<16x896xbf16, #tpu.memory_space<vmem>>, %arg2: memref<896x512xbf16, #tpu.memory_space<vmem>>, %arg3: memref<1x512xf32, #tpu.memory_space<vmem>>, %arg4: memref<16x512xbf16, #tpu.memory_space<vmem>>) attributes {dimension_semantics = [#tpu.dimension_semantics<parallel>], iteration_bounds = array<i64: 1>, scalar_prefetch = 0 : i64, scratch_operands = 0 : i64, tpu.core_type = #tpu.core_type<tc>, window_params = [{transform_indices = @transform_0, window_bounds = array<i64: 16, 896>}, {pipeline_mode = #tpu.pipeline_mode<synchronous>, transform_indices = @transform_1, window_bounds = array<i64: 896, 512>}, {pipeline_mode = #tpu.pipeline_mode<synchronous>, transform_indices = @transform_2, window_bounds = array<i64: 1, 512>}, {transform_indices = @transform_3, window_bounds = array<i64: 16, 512>}]} {
    %c0 = arith.constant 0 : index
    %c0_0 = arith.constant 0 : index
    %0 = vector.load %arg1[%c0, %c0_0] : memref<16x896xbf16, #tpu.memory_space<vmem>>, vector<16x896xbf16>
    %c0_1 = arith.constant 0 : index
    %c0_2 = arith.constant 0 : index
    %1 = vector.load %arg2[%c0_1, %c0_2] : memref<896x512xbf16, #tpu.memory_space<vmem>>, vector<896x512xbf16>
    %cst = arith.constant dense<0.000000e+00> : vector<16x512xf32>
    %2 = tpu.matmul %0, %1, %cst {dimension_numbers = #tpu.dot_dimension_numbers<[1], [0], [0], [1], [0, 0, 1, 1], [], []>} : vector<16x896xbf16>, vector<896x512xbf16>, vector<16x512xf32> -> vector<16x512xf32>
    %c0_3 = arith.constant 0 : index
    %c0_4 = arith.constant 0 : index
    %3 = vector.load %arg3[%c0_3, %c0_4] : memref<1x512xf32, #tpu.memory_space<vmem>>, vector<1x512xf32>
    %4 = vector.broadcast %3 : vector<1x512xf32> to vector<16x512xf32>
    %5 = arith.addf %2, %4 : vector<16x512xf32>
    %6 = arith.negf %5 : vector<16x512xf32>
    %7 = math.exp %6 : vector<16x512xf32>
    %cst_5 = arith.constant 1.000000e+00 : f32
    %8 = vector.broadcast %cst_5 : f32 to vector<16x512xf32>
    %9 = arith.addf %8, %7 : vector<16x512xf32>
    %10 = arith.divf %8, %9 : vector<16x512xf32>
    %11 = arith.mulf %5, %10 : vector<16x512xf32>
    %12 = arith.truncf %11 : vector<16x512xf32> to vector<16x512xbf16>
    %c0_6 = arith.constant 0 : index
    %c0_7 = arith.constant 0 : index
    %13 = vector.load %arg4[%c0_6, %c0_7] : memref<16x512xbf16, #tpu.memory_space<vmem>>, vector<16x512xbf16>
    tpu.vector_store %arg4[%c0_6, %c0_7], %12 {strides = array<i32>} : memref<16x512xbf16, #tpu.memory_space<vmem>>, vector<16x512xbf16>,
    return
  }
  func.func @transform_0(%arg0: i32) -> (i32, i32) {
    %c0_i32 = arith.constant 0 : i32
    %c0_i32_0 = arith.constant 0 : i32
    return %arg0, %c0_i32 : i32, i32
  }
  func.func @transform_1(%arg0: i32) -> (i32, i32) {
    %c0_i32 = arith.constant 0 : i32
    %c0_i32_0 = arith.constant 0 : i32
    %c0_i32_1 = arith.constant 0 : i32
    return %c0_i32, %c0_i32_0 : i32, i32
  }
  func.func @transform_2(%arg0: i32) -> (i32, i32) {
    %c0_i32 = arith.constant 0 : i32
    %c0_i32_0 = arith.constant 0 : i32
    %c0_i32_1 = arith.constant 0 : i32
    return %c0_i32, %c0_i32_0 : i32, i32
  }
  func.func @transform_3(%arg0: i32) -> (i32, i32) {
    %c0_i32 = arith.constant 0 : i32
    %c0_i32_0 = arith.constant 0 : i32
    return %arg0, %c0_i32 : i32, i32
  }
}

</mosaic_0001>

<bundles_post_ra>
// kernel: tpu_custom_call.1
= control target key start
LH: loop header
LB: loop body
LE: loop exit
PB: predicated region body
PF: predicated region fallthrough
CT: control target
= control target key end

     0   :  { %8 = vsyncpa [#allocation3], 0  ;;  %s2720_s0 = inlined_call_operand.hbm [shape: bf16[16,896], index: 0, kind: input, shape index: {}]   ;;  %s2721_s1 = inlined_call_operand.hbm [shape: bf16[896,512], index: 1, kind: input, shape index: {}]   ;;  %s2722_s2 = inlined_call_operand.hbm [shape: f32[1,512], index: 2, kind: input, shape index: {}]   ;;  %s2723_s3 = inlined_call_operand.hbm [shape: bf16[16,512], index: 3, kind: output, shape index: {}]  }
   0x1   :  { %9 = vsyncpa [#allocation6], 0 }
   0x2   :  { %10 = vsyncpa [#allocation4], 0  ;;  %s2631_s12 = smov [#allocation5]  }
   0x3   :  { %s28_s13 = sshll.u32 %s2631_s12, 4  ;;  %s29_s13 = int_to_ptr.vmem [resolvable:$true] %s28_s13 }
   0x4   :  { %s2553_s14 = scalar_lea.vmem %s29_s13, 28672  ;;  %p2558_p1 = scmp.lt.s32.totalorder %s29_s13, %s29_s13 }
   0x5   :  { %p2554_p0 = scmp.ne.s32.totalorder %s29_s13, %s2553_s14  ;;  %p2559_p2 = scmp.lt.s32.totalorder %s2553_s14, %s2553_s14 }
   0x7   :  { %p2560_p3 = por %p2559_p2, %p2558_p1 }
   0x9   :  { %p2561_p4 = pnand %p2560_p3, %p2554_p0 }
   0xb   :  { %2564 = shalt.err (!%p2561_p4)
}
   0xc   :  { %s2632_s15 = smov 256   ;;  %s2633_s16 = smov 16  }
   0xd   :  { %34 = dma.hbm_to_vmem [thread:$0]  %s2721_s1, 28672, %s29_s13, [#allocation6], %s2632_s15, %s2632_s15, %s2633_s16  }
   0xe   :  { %s2634_s19 = smov [#allocation2]  }
   0xf   :  { %s16_s20 = sshll.u32 %s2634_s19, 4  ;;  %s17_s20 = int_to_ptr.vmem [resolvable:$true] %s16_s20 }
  0x10   :  { %s2573_s21 = scalar_lea.vmem %s17_s20, 896  ;;  %p2578_p6 = scmp.lt.s32.totalorder %s17_s20, %s17_s20 }
  0x11   :  { %p2574_p5 = scmp.ne.s32.totalorder %s17_s20, %s2573_s21  ;;  %p2579_p7 = scmp.lt.s32.totalorder %s2573_s21, %s2573_s21 }
  0x13   :  { %p2580_p8 = por %p2579_p7, %p2578_p6 }
  0x15   :  { %p2581_p9 = pnand %p2580_p8, %p2574_p5 }
  0x17   :  { %2584 = shalt.err (!%p2581_p9)
}
  0x18   :  { %s2635_s22 = smov 448   ;;  %s2636_s23 = smov 28  }
  0x19   :  { %22 = dma.hbm_to_vmem [thread:$0]  %s2720_s0, 896, %s17_s20, [#allocation3], %s2635_s22, %s2635_s22, %s2636_s23  }
  0x1a   :  { %s2637_s26 = smov [#allocation7]  }
  0x1b   :  { %s41_s27 = sshll.u32 %s2637_s26, 4  ;;  %s42_s27 = int_to_ptr.vmem [resolvable:$true] %s41_s27 }
  0x1c   :  { %s2593_s1 = scalar_lea.vmem %s42_s27, 64  ;;  %p2598_p11 = scmp.lt.s32.totalorder %s42_s27, %s42_s27 }
  0x1d   :  { %p2594_p10 = scmp.ne.s32.totalorder %s42_s27, %s2593_s1  ;;  %p2599_p12 = scmp.lt.s32.totalorder %s2593_s1, %s2593_s1 }
  0x1f   :  { %p2600_p13 = por %p2599_p12, %p2598_p11 }
  0x21   :  { %p2601_p0 = pnand %p2600_p13, %p2594_p10 }
  0x23   :  { %2604 = shalt.err (!%p2601_p0)
}
  0x24   :  { %44 = dma.hbm_to_vmem [thread:$0]  %s2722_s2, 64, %s42_s27, [#allocation6]  }
  0x25   :  { %2625 = dma.done.wait [#allocation3], 896  }
  0x26   :  { %2626 = vsyncadd [#allocation3], 4294966400 }
  0x27   :  { %2627 = dma.done.wait [#allocation6], 28736  }
  0x28   :  { %2628 = vsyncadd [#allocation6], 4294938560  ;;  %v2167_v0 = vld [vmem:[#allocation5 + $0xe4] ss:$16 sps:$4 sm:$0xff]   ;;  %v2171_v2 = vld [vmem:[#allocation5 + $0xe0] ss:$16 sps:$4 sm:$0xff]  }
  0x29   :  { %v2169_v1 = vld [vmem:[#allocation5 + $0x2e4] ss:$16 sps:$4 sm:$0xff]   ;;  %1465 = vmatprep.subr.bf16.mxu0 %v2167_v0  ;;  %v2172_v3 = vld [vmem:[#allocation5 + $0x2e0] ss:$16 sps:$4 sm:$0xff]   ;;  %v2672_v49 = vld [vmem:[#allocation2 + $0x4] ss:$28 sps:$4 sm:$0xff]  }
  0x2a   :  { %1508 = vmatprep.subr.bf16.mxu1 %v2169_v1  ;;  %v2173_v4 = vld [vmem:[#allocation5 + $0xc4] ss:$16 sps:$4 sm:$0xff]   ;;  %1466 = vmatpush1.bf16.msra.mxu0 %v2171_v2  ;;  %v2177_v6 = vld [vmem:[#allocation5 + $0xc0] ss:$16 sps:$4 sm:$0xff]   ;;  %s2639_s0 = smov [#allocation8]  }
  0x2b   :  { %1509 = vmatpush1.bf16.msra.mxu1 %v2172_v3  ;;  %v2175_v5 = vld [vmem:[#allocation5 + $0x2c4] ss:$16 sps:$4 sm:$0xff]   ;;  %1467 = vmatprep.subr.bf16.mxu0 %v2173_v4  ;;  %v2178_v7 = vld [vmem:[#allocation5 + $0x2c0] ss:$16 sps:$4 sm:$0xff]   ;;  %s1898_s2 = sshll.u32 %s2639_s0, 4  ;;  %s1899_s2 = int_to_ptr.vmem [resolvable:$true] %s1898_s2 }
  0x2c   :  { %1510 = vmatprep.subr.bf16.mxu1 %v2175_v5  ;;  %v2179_v8 = vld [vmem:[#allocation5 + $0xa4] ss:$16 sps:$4 sm:$0xff]   ;;  %v2183_v10 = vld [vmem:[#allocation5 + $0xa0] ss:$16 sps:$4 sm:$0xff]   ;;  %1497 = vmatprep.mubr.bf16.mxu0 %v2672_v49  ;;  %s2605_s30 = scalar_lea.vmem %s1899_s2, 512  ;;  %p2610_p2 = scmp.lt.s32.totalorder %s1899_s2, %s1899_s2 }
  0x2d   :  { %v2181_v9 = vld [vmem:[#allocation5 + $0x2a4] ss:$16 sps:$4 sm:$0xff]   ;;  %v2184_v11 = vld [vmem:[#allocation5 + $0x2a0] ss:$16 sps:$4 sm:$0xff]   ;;  %p2606_p1 = scmp.ne.s32.totalorder %s1899_s2, %s2605_s30  ;;  %p2611_p3 = scmp.lt.s32.totalorder %s2605_s30, %s2605_s30 }
  0x2e   :  { %1468 = vmatpush1.bf16.msra.mxu0 %v2177_v6  ;;  %v2185_v12 = vld [vmem:[#allocation5 + $0x84] ss:$16 sps:$4 sm:$0xff]   ;;  %v2189_v14 = vld [vmem:[#allocation5 + $0x80] ss:$16 sps:$4 sm:$0xff]  }
  0x2f   :  { %1511 = vmatpush1.bf16.msra.mxu1 %v2178_v7  ;;  %1469 = vmatprep.subr.bf16.mxu0 %v2179_v8  ;;  %v2187_v13 = vld [vmem:[#allocation5 + $0x284] ss:$16 sps:$4 sm:$0xff]   ;;  %v2190_v15 = vld [vmem:[#allocation5 + $0x280] ss:$16 sps:$4 sm:$0xff]   ;;  %p2612_p4 = por %p2611_p3, %p2610_p2 }
  0x30   :  { %1512 = vmatprep.subr.bf16.mxu1 %v2181_v9  ;;  %v2191_v16 = vld [vmem:[#allocation5 + $0x64] ss:$16 sps:$4 sm:$0xff]   ;;  %v2195_v18 = vld [vmem:[#allocation5 + $0x60] ss:$16 sps:$4 sm:$0xff]  }
  0x31   :  { %v2193_v17 = vld [vmem:[#allocation5 + $0x264] ss:$16 sps:$4 sm:$0xff]   ;;  %v2196_v19 = vld [vmem:[#allocation5 + $0x260] ss:$16 sps:$4 sm:$0xff]   ;;  %p2613_p5 = pnand %p2612_p4, %p2606_p1 }
  0x32   :  { %1470 = vmatpush1.bf16.msra.mxu0 %v2183_v10  ;;  %v2197_v20 = vld [vmem:[#allocation5 + $0x44] ss:$16 sps:$4 sm:$0xff]   ;;  %v2201_v22 = vld [vmem:[#allocation5 + $0x40] ss:$16 sps:$4 sm:$0xff]  }
  0x33   :  { %1513 = vmatpush1.bf16.msra.mxu1 %v2184_v11  ;;  %1471 = vmatprep.subr.bf16.mxu0 %v2185_v12  ;;  %v2199_v21 = vld [vmem:[#allocation5 + $0x244] ss:$16 sps:$4 sm:$0xff]   ;;  %v2202_v23 = vld [vmem:[#allocation5 + $0x240] ss:$16 sps:$4 sm:$0xff]  }
  0x34   :  { %1514 = vmatprep.subr.bf16.mxu1 %v2187_v13  ;;  %v2203_v24 = vld [vmem:[#allocation5 + $0x24] ss:$16 sps:$4 sm:$0xff]   ;;  %v2207_v26 = vld [vmem:[#allocation5 + $0x20] ss:$16 sps:$4 sm:$0xff]  }
  0x35   :  { %v2205_v25 = vld [vmem:[#allocation5 + $0x224] ss:$16 sps:$4 sm:$0xff]   ;;  %v2208_v27 = vld [vmem:[#allocation5 + $0x220] ss:$16 sps:$4 sm:$0xff]  }
  0x36   :  { %1472 = vmatpush1.bf16.msra.mxu0 %v2189_v14  ;;  %v2209_v28 = vld [vmem:[#allocation5 + $0x4] ss:$16 sps:$4 sm:$0xff]   ;;  %v2213_v30 = vld [vmem:[#allocation5] ss:$16 sps:$4 sm:$0xff]   ;;  %v2638_v14 = vmov 0  }
  0x37   :  { %1515 = vmatpush1.bf16.msra.mxu1 %v2190_v15  ;;  %1473 = vmatprep.subr.bf16.mxu0 %v2191_v16  ;;  %v2211_v29 = vld [vmem:[#allocation5 + $0x204] ss:$16 sps:$4 sm:$0xff]   ;;  %v2214_v31 = vld [vmem:[#allocation5 + $0x200] ss:$16 sps:$4 sm:$0xff]  }
  0x38   :  { %1516 = vmatprep.subr.bf16.mxu1 %v2193_v17  ;;  %v2215_v32 = vld [vmem:[#allocation5 + $0x1e4] ss:$16 sps:$4 sm:$0xff]   ;;  %v2219_v34 = vld [vmem:[#allocation5 + $0x1e0] ss:$16 sps:$4 sm:$0xff]  }
  0x39   :  { %v2217_v33 = vld [vmem:[#allocation5 + $0x3e4] ss:$16 sps:$4 sm:$0xff]   ;;  %v2220_v35 = vld [vmem:[#allocation5 + $0x3e0] ss:$16 sps:$4 sm:$0xff]  }
  0x3a   :  { %1474 = vmatpush1.bf16.msra.mxu0 %v2195_v18  ;;  %v2221_v36 = vld [vmem:[#allocation5 + $0x1c4] ss:$16 sps:$4 sm:$0xff]   ;;  %v2225_v38 = vld [vmem:[#allocation5 + $0x1c0] ss:$16 sps:$4 sm:$0xff]  }
  0x3b   :  { %1517 = vmatpush1.bf16.msra.mxu1 %v2196_v19  ;;  %1475 = vmatprep.subr.bf16.mxu0 %v2197_v20  ;;  %v2223_v37 = vld [vmem:[#allocation5 + $0x3c4] ss:$16 sps:$4 sm:$0xff]   ;;  %v2226_v39 = vld [vmem:[#allocation5 + $0x3c0] ss:$16 sps:$4 sm:$0xff]  }
  0x3c   :  { %1518 = vmatprep.subr.bf16.mxu1 %v2199_v21  ;;  %v2227_v40 = vld [vmem:[#allocation5 + $0x1a4] ss:$16 sps:$4 sm:$0xff]   ;;  %v2231_v42 = vld [vmem:[#allocation5 + $0x1a0] ss:$16 sps:$4 sm:$0xff]  }
  0x3d   :  { %v2229_v41 = vld [vmem:[#allocation5 + $0x3a4] ss:$16 sps:$4 sm:$0xff]   ;;  %v2232_v43 = vld [vmem:[#allocation5 + $0x3a0] ss:$16 sps:$4 sm:$0xff]  }
  0x3e   :  { %1476 = vmatpush1.bf16.msra.mxu0 %v2201_v22  ;;  %v2233_v44 = vld [vmem:[#allocation5 + $0x184] ss:$16 sps:$4 sm:$0xff]   ;;  %v2237_v46 = vld [vmem:[#allocation5 + $0x180] ss:$16 sps:$4 sm:$0xff]  }
  0x3f   :  { %1519 = vmatpush1.bf16.msra.mxu1 %v2202_v23  ;;  %1477 = vmatprep.subr.bf16.mxu0 %v2203_v24  ;;  %v2235_v45 = vld [vmem:[#allocation5 + $0x384] ss:$16 sps:$4 sm:$0xff]   ;;  %v2238_v47 = vld [vmem:[#allocation5 + $0x380] ss:$16 sps:$4 sm:$0xff]  }
  0x40   :  { %1520 = vmatprep.subr.bf16.mxu1 %v2205_v25  ;;  %v2239_v48 = vld [vmem:[#allocation5 + $0x164] ss:$16 sps:$4 sm:$0xff]   ;;  %v2243_v52 = vld [vmem:[#allocation5 + $0x160] ss:$16 sps:$4 sm:$0xff]  }
  0x41   :  { %v2241_v50 = vld [vmem:[#allocation5 + $0x364] ss:$16 sps:$4 sm:$0xff]   ;;  %v2244_v53 = vld [vmem:[#allocation5 + $0x360] ss:$16 sps:$4 sm:$0xff]  }
  0x42   :  { %1478 = vmatpush1.bf16.msra.mxu0 %v2207_v26  ;;  %v2674_v51 = vld [vmem:[#allocation2 + $0xc] ss:$28 sps:$4 sm:$0xff]   ;;  %v2678_v4 = vld [vmem:[#allocation2] ss:$28 sps:$4 sm:$0xff]  }
  0x43   :  { %1521 = vmatpush1.bf16.msra.mxu1 %v2208_v27  ;;  %1479 = vmatprep.subr.bf16.mxu0 %v2209_v28  ;;  %v2245_v54 = vld [vmem:[#allocation5 + $0x144] ss:$16 sps:$4 sm:$0xff]   ;;  %v2249_v56 = vld [vmem:[#allocation5 + $0x140] ss:$16 sps:$4 sm:$0xff]  }
  0x44   :  { %1522 = vmatprep.subr.bf16.mxu1 %v2211_v29  ;;  %1540 = vmatprep.mubr.bf16.mxu1 %v2674_v51  ;;  %v2247_v55 = vld [vmem:[#allocation5 + $0x344] ss:$16 sps:$4 sm:$0xff]   ;;  %v2250_v57 = vld [vmem:[#allocation5 + $0x340] ss:$16 sps:$4 sm:$0xff]  }
  0x45   :  { %v2251_v58 = vld [vmem:[#allocation5 + $0x124] ss:$16 sps:$4 sm:$0xff]   ;;  %v2255_v60 = vld [vmem:[#allocation5 + $0x120] ss:$16 sps:$4 sm:$0xff]  }
  0x46   :  { %1480 = vmatpush1.bf16.msra.mxu0 %v2213_v30  ;;  %v2253_v59 = vld [vmem:[#allocation5 + $0x324] ss:$16 sps:$4 sm:$0xff]   ;;  %v2256_v61 = vld [vmem:[#allocation5 + $0x320] ss:$16 sps:$4 sm:$0xff]  }
  0x47   :  { %1523 = vmatpush1.bf16.msra.mxu1 %v2214_v31  ;;  %1481 = vmatprep.subr.bf16.mxu0 %v2215_v32  ;;  %v2257_v62 = vld [vmem:[#allocation5 + $0x104] ss:$16 sps:$4 sm:$0xff]   ;;  %v2261_v0 = vld [vmem:[#allocation5 + $0x100] ss:$16 sps:$4 sm:$0xff]  }
  0x48   :  { %1524 = vmatprep.subr.bf16.mxu1 %v2217_v33  ;;  %v2259_v63 = vld [vmem:[#allocation5 + $0x304] ss:$16 sps:$4 sm:$0xff]   ;;  %v2262_v1 = vld [vmem:[#allocation5 + $0x300] ss:$16 sps:$4 sm:$0xff]  }
  0x49   :  { %v2271_v2 = vld [vmem:[#allocation5 + $0x4e4] ss:$16 sps:$4 sm:$0xff]   ;;  %v2680_v5 = vld [vmem:[#allocation2 + $0x8] ss:$28 sps:$4 sm:$0xff]  }
  0x4a   :  { %1482 = vmatpush2.bf16.msra.mxu0 %v2219_v34  ;;  %v2274_v3 = vld [vmem:[#allocation5 + $0x6e4] ss:$16 sps:$4 sm:$0xff]   ;;  %v2269_v6 = vld [vmem:[#allocation5 + $0x4e0] ss:$16 sps:$4 sm:$0xff]  }
  0x4b   :  { %1525 = vmatpush2.bf16.msra.mxu1 %v2220_v35  ;;  %1483 = vmatprep.subr.bf16.mxu0 %v2221_v36  ;;  %v2272_v7 = vld [vmem:[#allocation5 + $0x6e0] ss:$16 sps:$4 sm:$0xff]   ;;  %v2277_v8 = vld [vmem:[#allocation5 + $0x4c4] ss:$16 sps:$4 sm:$0xff]   ;;  %v2685_v35 = vld [vmem:[#allocation2 + $0x14] ss:$28 sps:$4 sm:$0xff]  }
  0x4c   :  { %1526 = vmatprep.subr.bf16.mxu1 %v2223_v37  ;;  %v2280_v9 = vld [vmem:[#allocation5 + $0x6c4] ss:$16 sps:$4 sm:$0xff]   ;;  %v2275_v10 = vld [vmem:[#allocation5 + $0x4c0] ss:$16 sps:$4 sm:$0xff]  }
  0x4d   :  { %v2278_v11 = vld [vmem:[#allocation5 + $0x6c0] ss:$16 sps:$4 sm:$0xff]   ;;  %v2283_v12 = vld [vmem:[#allocation5 + $0x4a4] ss:$16 sps:$4 sm:$0xff]  }
  0x4e   :  { %1484 = vmatpush2.bf16.msra.mxu0 %v2225_v38  ;;  %v2286_v13 = vld [vmem:[#allocation5 + $0x6a4] ss:$16 sps:$4 sm:$0xff]   ;;  %v2281_v15 = vld [vmem:[#allocation5 + $0x4a0] ss:$16 sps:$4 sm:$0xff]  }
  0x4f   :  { %1527 = vmatpush2.bf16.msra.mxu1 %v2226_v39  ;;  %1485 = vmatprep.subr.bf16.mxu0 %v2227_v40  ;;  %v2284_v16 = vld [vmem:[#allocation5 + $0x6a0] ss:$16 sps:$4 sm:$0xff]   ;;  %v2289_v17 = vld [vmem:[#allocation5 + $0x484] ss:$16 sps:$4 sm:$0xff]   ;;  %v2323_v39 = vld [vmem:[#allocation5 + $0xec] ss:$16 sps:$4 sm:$0xff]  }
  0x50   :  { %1528 = vmatprep.subr.bf16.mxu1 %v2229_v41  ;;  %v2292_v18 = vld [vmem:[#allocation5 + $0x684] ss:$16 sps:$4 sm:$0xff]   ;;  %v2287_v19 = vld [vmem:[#allocation5 + $0x480] ss:$16 sps:$4 sm:$0xff]  }
  0x51   :  { %v2290_v20 = vld [vmem:[#allocation5 + $0x680] ss:$16 sps:$4 sm:$0xff]   ;;  %v2295_v21 = vld [vmem:[#allocation5 + $0x464] ss:$16 sps:$4 sm:$0xff]  }
  0x52   :  { %1486 = vmatpush2.bf16.msra.mxu0 %v2231_v42  ;;  %v2298_v22 = vld [vmem:[#allocation5 + $0x664] ss:$16 sps:$4 sm:$0xff]   ;;  %v2293_v23 = vld [vmem:[#allocation5 + $0x460] ss:$16 sps:$4 sm:$0xff]   ;;  %v2321_v42 = vld [vmem:[#allocation5 + $0xe8] ss:$16 sps:$4 sm:$0xff]  }
  0x53   :  { %1529 = vmatpush2.bf16.msra.mxu1 %v2232_v43  ;;  %1487 = vmatprep.subr.bf16.mxu0 %v2233_v44  ;;  %v2296_v24 = vld [vmem:[#allocation5 + $0x660] ss:$16 sps:$4 sm:$0xff]   ;;  %v2301_v25 = vld [vmem:[#allocation5 + $0x444] ss:$16 sps:$4 sm:$0xff]   ;;  %v2329_v44 = vld [vmem:[#allocation5 + $0xcc] ss:$16 sps:$4 sm:$0xff]  }
  0x54   :  { %1530 = vmatprep.subr.bf16.mxu1 %v2235_v45  ;;  %v2304_v26 = vld [vmem:[#allocation5 + $0x644] ss:$16 sps:$4 sm:$0xff]   ;;  %v2299_v27 = vld [vmem:[#allocation5 + $0x440] ss:$16 sps:$4 sm:$0xff]  }
  0x55   :  { %v2302_v28 = vld [vmem:[#allocation5 + $0x640] ss:$16 sps:$4 sm:$0xff]   ;;  %v2307_v29 = vld [vmem:[#allocation5 + $0x424] ss:$16 sps:$4 sm:$0xff]  }
  0x56   :  { %1488 = vmatpush2.bf16.msra.mxu0 %v2237_v46  ;;  %v2310_v30 = vld [vmem:[#allocation5 + $0x624] ss:$16 sps:$4 sm:$0xff]   ;;  %v2305_v31 = vld [vmem:[#allocation5 + $0x420] ss:$16 sps:$4 sm:$0xff]   ;;  %v2327_v46 = vld [vmem:[#allocation5 + $0xc8] ss:$16 sps:$4 sm:$0xff]  }
  0x57   :  { %1531 = vmatpush2.bf16.msra.mxu1 %v2238_v47  ;;  %1489 = vmatprep.subr.bf16.mxu0 %v2239_v48  ;;  %v2308_v32 = vld [vmem:[#allocation5 + $0x620] ss:$16 sps:$4 sm:$0xff]   ;;  %v2313_v33 = vld [vmem:[#allocation5 + $0x404] ss:$16 sps:$4 sm:$0xff]   ;;  %v2335_v48 = vld [vmem:[#allocation5 + $0xac] ss:$16 sps:$4 sm:$0xff]  }
  0x58   :  { %1532 = vmatprep.subr.bf16.mxu1 %v2241_v50  ;;  %v2316_v34 = vld [vmem:[#allocation5 + $0x604] ss:$16 sps:$4 sm:$0xff]   ;;  %v2311_v36 = vld [vmem:[#allocation5 + $0x400] ss:$16 sps:$4 sm:$0xff]  }
  0x59   :  { %v2314_v37 = vld [vmem:[#allocation5 + $0x600] ss:$16 sps:$4 sm:$0xff]   ;;  %v2319_v38 = vld [vmem:[#allocation5 + $0x5e4] ss:$16 sps:$4 sm:$0xff]  }
  0x5a   :  { %1490 = vmatpush2.bf16.msra.mxu0 %v2243_v52  ;;  %v2317_v40 = vld [vmem:[#allocation5 + $0x5e0] ss:$16 sps:$4 sm:$0xff]   ;;  %v2326_v43 = vld [vmem:[#allocation5 + $0x5c4] ss:$16 sps:$4 sm:$0xff]   ;;  %v2333_v52 = vld [vmem:[#allocation5 + $0xa8] ss:$16 sps:$4 sm:$0xff]  }
  0x5b   :  { %1533 = vmatpush2.bf16.msra.mxu1 %v2244_v53  ;;  %1491 = vmatprep.subr.bf16.mxu0 %v2245_v54  ;;  %v2688_v41 = vld [vmem:[#allocation2 + $0x18] ss:$28 sps:$4 sm:$0xff]   ;;  %v2332_v47 = vld [vmem:[#allocation5 + $0x5a4] ss:$16 sps:$4 sm:$0xff]  }
  0x5c   :  { %1534 = vmatprep.subr.bf16.mxu1 %v2247_v55  ;;  %v2324_v45 = vld [vmem:[#allocation5 + $0x5c0] ss:$16 sps:$4 sm:$0xff]   ;;  %v2338_v53 = vld [vmem:[#allocation5 + $0x584] ss:$16 sps:$4 sm:$0xff]   ;;  %v2341_v54 = vld [vmem:[#allocation5 + $0x8c] ss:$16 sps:$4 sm:$0xff]  }
  0x5d   :  { %v2330_v50 = vld [vmem:[#allocation5 + $0x5a0] ss:$16 sps:$4 sm:$0xff]  }
  0x5e   :  { %1492 = vmatpush2.bf16.msra.mxu0 %v2249_v56  ;;  %v2336_v55 = vld [vmem:[#allocation5 + $0x580] ss:$16 sps:$4 sm:$0xff]   ;;  %v2339_v56 = vld [vmem:[#allocation5 + $0x88] ss:$16 sps:$4 sm:$0xff]  }
  0x5f   :  { %1535 = vmatpush2.bf16.msra.mxu1 %v2250_v57  ;;  %1493 = vmatprep.subr.bf16.mxu0 %v2251_v58  ;;  %v2344_v57 = vld [vmem:[#allocation5 + $0x564] ss:$16 sps:$4 sm:$0xff]   ;;  %v2347_v58 = vld [vmem:[#allocation5 + $0x6c] ss:$16 sps:$4 sm:$0xff]  }
  0x60   :  { %1536 = vmatprep.subr.bf16.mxu1 %v2253_v59  ;;  %v2342_v59 = vld [vmem:[#allocation5 + $0x560] ss:$16 sps:$4 sm:$0xff]  }
  0x62   :  { %1494 = vmatpush2.bf16.msra.mxu0 %v2255_v60  ;;  %v2350_v60 = vld [vmem:[#allocation5 + $0x544] ss:$16 sps:$4 sm:$0xff]  }
  0x63   :  { %1537 = vmatpush2.bf16.msra.mxu1 %v2256_v61  ;;  %1495 = vmatprep.subr.bf16.mxu0 %v2257_v62  ;;  %v2353_v61 = vld [vmem:[#allocation5 + $0x4c] ss:$16 sps:$4 sm:$0xff]   ;;  %v2348_v62 = vld [vmem:[#allocation5 + $0x540] ss:$16 sps:$4 sm:$0xff]  }
  0x64   :  { %1538 = vmatprep.subr.bf16.mxu1 %v2259_v63  ;;  %v2351_v63 = vld [vmem:[#allocation5 + $0x48] ss:$16 sps:$4 sm:$0xff]  }
  0x66   :  { %1496 = vmatpush2.bf16.msra.mxu0 %v2261_v0  ;;  %v2356_v0 = vld [vmem:[#allocation5 + $0x524] ss:$16 sps:$4 sm:$0xff]  }
  0x67   :  { %1539 = vmatpush2.bf16.msra.mxu1 %v2262_v1  ;;  %1551 = vmatprep.subr.bf16.mxu0 %v2271_v2  ;;  %v2359_v1 = vld [vmem:[#allocation5 + $0x2c] ss:$16 sps:$4 sm:$0xff]   ;;  %v2354_v2 = vld [vmem:[#allocation5 + $0x520] ss:$16 sps:$4 sm:$0xff]  }
  0x68   :  { %1594 = vmatprep.subr.bf16.mxu1 %v2274_v3  ;;  %v2357_v3 = vld [vmem:[#allocation5 + $0x28] ss:$16 sps:$4 sm:$0xff]  }
  0x69   :  { %1498 = vmatmul.mubr.bf16.vlgmr.msra.gmra.mxu0 %v2678_v4 }
  0x6a   :  { %1541 = vmatmul.mubr.bf16.vlgmr.msra.gmra.mxu1 %v2680_v5  ;;  %1552 = vmatpush1.bf16.msra.mxu0 %v2269_v6  ;;  %v2362_v6 = vld [vmem:[#allocation5 + $0x504] ss:$16 sps:$4 sm:$0xff]  }
  0x6b   :  { %1595 = vmatpush1.bf16.msra.mxu1 %v2272_v7  ;;  %1553 = vmatprep.subr.bf16.mxu0 %v2277_v8  ;;  %v2365_v7 = vld [vmem:[#allocation5 + $0xc] ss:$16 sps:$4 sm:$0xff]   ;;  %v2360_v8 = vld [vmem:[#allocation5 + $0x500] ss:$16 sps:$4 sm:$0xff]  }
  0x6c   :  { %1596 = vmatprep.subr.bf16.mxu1 %v2280_v9  ;;  %1626 = vmatprep.mubr.bf16.mxu1 %v2638_v14  ;;  %v2363_v9 = vld [vmem:[#allocation5 + $0x8] ss:$16 sps:$4 sm:$0xff]  }
  0x6d   :  { %1583 = vmatprep.mubr.bf16.mxu0 %v2685_v35 }
  0x6e   :  { %1554 = vmatpush1.bf16.msra.mxu0 %v2275_v10  ;;  %v2371_v10 = vld [vmem:[#allocation5 + $0x1ec] ss:$16 sps:$4 sm:$0xff]  }
  0x6f   :  { %1597 = vmatpush1.bf16.msra.mxu1 %v2278_v11  ;;  %1555 = vmatprep.subr.bf16.mxu0 %v2283_v12  ;;  %v2374_v11 = vld [vmem:[#allocation5 + $0x2ec] ss:$16 sps:$4 sm:$0xff]   ;;  %v2692_v12 = vld [vmem:[#allocation2 + $0x10] ss:$28 sps:$4 sm:$0xff]  }
  0x70   :  { %1598 = vmatprep.subr.bf16.mxu1 %v2286_v13  ;;  %v2369_v13 = vld [vmem:[#allocation5 + $0x1e8] ss:$16 sps:$4 sm:$0xff]  }
  0x72   :  { %1556 = vmatpush1.bf16.msra.mxu0 %v2281_v15  ;;  %v2372_v15 = vld [vmem:[#allocation5 + $0x2e8] ss:$16 sps:$4 sm:$0xff]  }
  0x73   :  { %1599 = vmatpush1.bf16.msra.mxu1 %v2284_v16  ;;  %1557 = vmatprep.subr.bf16.mxu0 %v2289_v17  ;;  %v2377_v16 = vld [vmem:[#allocation5 + $0x1cc] ss:$16 sps:$4 sm:$0xff]  }
  0x74   :  { %1600 = vmatprep.subr.bf16.mxu1 %v2292_v18  ;;  %v2380_v17 = vld [vmem:[#allocation5 + $0x2cc] ss:$16 sps:$4 sm:$0xff]   ;;  %v2375_v18 = vld [vmem:[#allocation5 + $0x1c8] ss:$16 sps:$4 sm:$0xff]  }
  0x76   :  { %1558 = vmatpush1.bf16.msra.mxu0 %v2287_v19  ;;  %v2378_v19 = vld [vmem:[#allocation5 + $0x2c8] ss:$16 sps:$4 sm:$0xff]  }
  0x77   :  { %1601 = vmatpush1.bf16.msra.mxu1 %v2290_v20  ;;  %1559 = vmatprep.subr.bf16.mxu0 %v2295_v21  ;;  %v2383_v20 = vld [vmem:[#allocation5 + $0x1ac] ss:$16 sps:$4 sm:$0xff]  }
  0x78   :  { %1602 = vmatprep.subr.bf16.mxu1 %v2298_v22  ;;  %v2386_v21 = vld [vmem:[#allocation5 + $0x2ac] ss:$16 sps:$4 sm:$0xff]   ;;  %v2381_v22 = vld [vmem:[#allocation5 + $0x1a8] ss:$16 sps:$4 sm:$0xff]  }
  0x7a   :  { %1560 = vmatpush1.bf16.msra.mxu0 %v2293_v23  ;;  %v2384_v23 = vld [vmem:[#allocation5 + $0x2a8] ss:$16 sps:$4 sm:$0xff]  }
  0x7b   :  { %1603 = vmatpush1.bf16.msra.mxu1 %v2296_v24  ;;  %1561 = vmatprep.subr.bf16.mxu0 %v2301_v25  ;;  %v2389_v24 = vld [vmem:[#allocation5 + $0x18c] ss:$16 sps:$4 sm:$0xff]  }
  0x7c   :  { %1604 = vmatprep.subr.bf16.mxu1 %v2304_v26  ;;  %v2392_v25 = vld [vmem:[#allocation5 + $0x28c] ss:$16 sps:$4 sm:$0xff]   ;;  %v2387_v26 = vld [vmem:[#allocation5 + $0x188] ss:$16 sps:$4 sm:$0xff]  }
  0x7e   :  { %1562 = vmatpush1.bf16.msra.mxu0 %v2299_v27  ;;  %v2390_v27 = vld [vmem:[#allocation5 + $0x288] ss:$16 sps:$4 sm:$0xff]  }
  0x7f   :  { %1605 = vmatpush1.bf16.msra.mxu1 %v2302_v28  ;;  %1563 = vmatprep.subr.bf16.mxu0 %v2307_v29  ;;  %v2395_v28 = vld [vmem:[#allocation5 + $0x16c] ss:$16 sps:$4 sm:$0xff]  }
  0x80   :  { %1606 = vmatprep.subr.bf16.mxu1 %v2310_v30  ;;  %v2398_v29 = vld [vmem:[#allocation5 + $0x26c] ss:$16 sps:$4 sm:$0xff]   ;;  %v2393_v30 = vld [vmem:[#allocation5 + $0x168] ss:$16 sps:$4 sm:$0xff]  }
  0x82   :  { %1564 = vmatpush1.bf16.msra.mxu0 %v2305_v31  ;;  %v2401_v31 = vld [vmem:[#allocation5 + $0x14c] ss:$16 sps:$4 sm:$0xff]  }
  0x83   :  { %1607 = vmatpush1.bf16.msra.mxu1 %v2308_v32  ;;  %1565 = vmatprep.subr.bf16.mxu0 %v2313_v33  ;;  %v2404_v32 = vld [vmem:[#allocation5 + $0x24c] ss:$16 sps:$4 sm:$0xff]   ;;  %v2399_v33 = vld [vmem:[#allocation5 + $0x148] ss:$16 sps:$4 sm:$0xff]  }
  0x84   :  { %1608 = vmatprep.subr.bf16.mxu1 %v2316_v34  ;;  %v2402_v34 = vld [vmem:[#allocation5 + $0x248] ss:$16 sps:$4 sm:$0xff]  }
  0x86   :  { %1566 = vmatpush1.bf16.msra.mxu0 %v2311_v36  ;;  %v2407_v36 = vld [vmem:[#allocation5 + $0x12c] ss:$16 sps:$4 sm:$0xff]  }
  0x87   :  { %1609 = vmatpush1.bf16.msra.mxu1 %v2314_v37  ;;  %1567 = vmatprep.subr.bf16.mxu0 %v2319_v38  ;;  %v2410_v37 = vld [vmem:[#allocation5 + $0x22c] ss:$16 sps:$4 sm:$0xff]   ;;  %v2405_v38 = vld [vmem:[#allocation5 + $0x128] ss:$16 sps:$4 sm:$0xff]  }
  0x88   :  { %1637 = vmatprep.subr.bf16.mxu1 %v2323_v39  ;;  %v2408_v39 = vld [vmem:[#allocation5 + $0x228] ss:$16 sps:$4 sm:$0xff]  }
  0x8a   :  { %1627 = vmatmul.mubr.bf16.vlgmr.msra.gmra.mxu1 %v2688_v41  ;;  %1568 = vmatpush2.bf16.msra.mxu0 %v2317_v40  ;;  %v2413_v40 = vld [vmem:[#allocation5 + $0x10c] ss:$16 sps:$4 sm:$0xff]  }
  0x8b   :  { %1638 = vmatpush1.bf16.msra.mxu1 %v2321_v42  ;;  %1569 = vmatprep.subr.bf16.mxu0 %v2326_v43  ;;  %v2416_v42 = vld [vmem:[#allocation5 + $0x20c] ss:$16 sps:$4 sm:$0xff]   ;;  %v2411_v43 = vld [vmem:[#allocation5 + $0x108] ss:$16 sps:$4 sm:$0xff]  }
  0x8c   :  { %1639 = vmatprep.subr.bf16.mxu1 %v2329_v44  ;;  %1669 = vmatprep.mubr.bf16.mxu1 %v2672_v49  ;;  %v2345_v49 = vld [vmem:[#allocation5 + $0x68] ss:$16 sps:$4 sm:$0xff]  }
  0x8d   :  { %v2414_v44 = vld [vmem:[#allocation5 + $0x208] ss:$16 sps:$4 sm:$0xff]  }
  0x8e   :  { %1570 = vmatpush2.bf16.msra.mxu0 %v2324_v45  ;;  %v2419_v45 = vld [vmem:[#allocation5 + $0x3ec] ss:$16 sps:$4 sm:$0xff]  }
  0x8f   :  { %1640 = vmatpush1.bf16.msra.mxu1 %v2327_v46  ;;  %1571 = vmatprep.subr.bf16.mxu0 %v2332_v47  ;;  %v2422_v46 = vld [vmem:[#allocation5 + $0x4ec] ss:$16 sps:$4 sm:$0xff]   ;;  %v2417_v47 = vld [vmem:[#allocation5 + $0x3e8] ss:$16 sps:$4 sm:$0xff]  }
  0x90   :  { %1641 = vmatprep.subr.bf16.mxu1 %v2335_v48  ;;  %v2420_v48 = vld [vmem:[#allocation5 + $0x4e8] ss:$16 sps:$4 sm:$0xff]  }
  0x92   :  { %1572 = vmatpush2.bf16.msra.mxu0 %v2330_v50  ;;  %v2425_v50 = vld [vmem:[#allocation5 + $0x3cc] ss:$16 sps:$4 sm:$0xff]  }
  0x93   :  { %1642 = vmatpush1.bf16.msra.mxu1 %v2333_v52  ;;  %1573 = vmatprep.subr.bf16.mxu0 %v2338_v53  ;;  %v2428_v52 = vld [vmem:[#allocation5 + $0x4cc] ss:$16 sps:$4 sm:$0xff]   ;;  %v2423_v53 = vld [vmem:[#allocation5 + $0x3c8] ss:$16 sps:$4 sm:$0xff]  }
  0x94   :  { %1643 = vmatprep.subr.bf16.mxu1 %v2341_v54  ;;  %v2426_v54 = vld [vmem:[#allocation5 + $0x4c8] ss:$16 sps:$4 sm:$0xff]  }
  0x96   :  { %1574 = vmatpush2.bf16.msra.mxu0 %v2336_v55  ;;  %v2431_v55 = vld [vmem:[#allocation5 + $0x3ac] ss:$16 sps:$4 sm:$0xff]  }
  0x97   :  { %1644 = vmatpush1.bf16.msra.mxu1 %v2339_v56  ;;  %1575 = vmatprep.subr.bf16.mxu0 %v2344_v57  ;;  %v2434_v56 = vld [vmem:[#allocation5 + $0x4ac] ss:$16 sps:$4 sm:$0xff]   ;;  %v2429_v57 = vld [vmem:[#allocation5 + $0x3a8] ss:$16 sps:$4 sm:$0xff]  }
  0x98   :  { %1645 = vmatprep.subr.bf16.mxu1 %v2347_v58  ;;  %v2432_v58 = vld [vmem:[#allocation5 + $0x4a8] ss:$16 sps:$4 sm:$0xff]  }
  0x9a   :  { %1576 = vmatpush2.bf16.msra.mxu0 %v2342_v59  ;;  %v2437_v59 = vld [vmem:[#allocation5 + $0x38c] ss:$16 sps:$4 sm:$0xff]  }
  0x9b   :  { %1646 = vmatpush1.bf16.msra.mxu1 %v2345_v49  ;;  %1577 = vmatprep.subr.bf16.mxu0 %v2350_v60  ;;  %v2440_v49 = vld [vmem:[#allocation5 + $0x48c] ss:$16 sps:$4 sm:$0xff]   ;;  %v2438_v60 = vld [vmem:[#allocation5 + $0x488] ss:$16 sps:$4 sm:$0xff]  }
  0x9c   :  { %1647 = vmatprep.subr.bf16.mxu1 %v2353_v61  ;;  %v2443_v61 = vld [vmem:[#allocation5 + $0x36c] ss:$16 sps:$4 sm:$0xff]  }
  0x9e   :  { %1578 = vmatpush2.bf16.msra.mxu0 %v2348_v62  ;;  %v2446_v62 = vld [vmem:[#allocation5 + $0x46c] ss:$16 sps:$4 sm:$0xff]  }
  0x9f   :  { %1648 = vmatpush1.bf16.msra.mxu1 %v2351_v63  ;;  %1579 = vmatprep.subr.bf16.mxu0 %v2356_v0  ;;  %v2441_v63 = vld [vmem:[#allocation5 + $0x368] ss:$16 sps:$4 sm:$0xff]   ;;  %v2449_v0 = vld [vmem:[#allocation5 + $0x34c] ss:$16 sps:$4 sm:$0xff]  }
  0xa0   :  { %1649 = vmatprep.subr.bf16.mxu1 %v2359_v1  ;;  %v2452_v1 = vld [vmem:[#allocation5 + $0x44c] ss:$16 sps:$4 sm:$0xff]  }
  0xa2   :  { %1580 = vmatpush2.bf16.msra.mxu0 %v2354_v2  ;;  %v2447_v2 = vld [vmem:[#allocation5 + $0x348] ss:$16 sps:$4 sm:$0xff]  }
  0xa3   :  { %1650 = vmatpush1.bf16.msra.mxu1 %v2357_v3  ;;  %1581 = vmatprep.subr.bf16.mxu0 %v2362_v6  ;;  %v2450_v3 = vld [vmem:[#allocation5 + $0x448] ss:$16 sps:$4 sm:$0xff]   ;;  %v2455_v6 = vld [vmem:[#allocation5 + $0x32c] ss:$16 sps:$4 sm:$0xff]  }
  0xa4   :  { %1651 = vmatprep.subr.bf16.mxu1 %v2365_v7  ;;  %v2458_v7 = vld [vmem:[#allocation5 + $0x42c] ss:$16 sps:$4 sm:$0xff]  }
  0xa6   :  { %1582 = vmatpush2.bf16.msra.mxu0 %v2360_v8  ;;  %v2453_v8 = vld [vmem:[#allocation5 + $0x328] ss:$16 sps:$4 sm:$0xff]  }
  0xa7   :  { %1652 = vmatpush1.bf16.msra.mxu1 %v2363_v9  ;;  %1680 = vmatprep.subr.bf16.mxu0 %v2374_v11  ;;  %v2456_v9 = vld [vmem:[#allocation5 + $0x428] ss:$16 sps:$4 sm:$0xff]   ;;  %v2464_v11 = vld [vmem:[#allocation5 + $0x40c] ss:$16 sps:$4 sm:$0xff]  }
  0xa8   :  { %1653 = vmatprep.subr.bf16.mxu1 %v2371_v10  ;;  %v2461_v10 = vld [vmem:[#allocation5 + $0x30c] ss:$16 sps:$4 sm:$0xff]  }
  0xa9   :  { %1584 = vmatmul.mubr.bf16.vlgmr.msra.gmra.mxu0 %v2692_v12 }
  0xaa   :  { %1681 = vmatpush1.bf16.msra.mxu0 %v2372_v15  ;;  %1712 = vmatprep.mubr.bf16.mxu0 %v2674_v51  ;;  %v2396_v51 = vld [vmem:[#allocation5 + $0x268] ss:$16 sps:$4 sm:$0xff]  }
  0xab   :  { %1654 = vmatpush2.bf16.msra.mxu1 %v2369_v13  ;;  %1682 = vmatprep.subr.bf16.mxu0 %v2380_v17  ;;  %v2459_v13 = vld [vmem:[#allocation5 + $0x308] ss:$16 sps:$4 sm:$0xff]   ;;  %v2470_v17 = vld [vmem:[#allocation5 + $0x6ec] ss:$16 sps:$4 sm:$0xff]  }
  0xac   :  { %1655 = vmatprep.subr.bf16.mxu1 %v2377_v16  ;;  %v2462_v15 = vld [vmem:[#allocation5 + $0x408] ss:$16 sps:$4 sm:$0xff]   ;;  %v2467_v16 = vld [vmem:[#allocation5 + $0x5ec] ss:$16 sps:$4 sm:$0xff]  }
  0xae   :  { %1683 = vmatpush1.bf16.msra.mxu0 %v2378_v19  ;;  %v2468_v19 = vld [vmem:[#allocation5 + $0x6e8] ss:$16 sps:$4 sm:$0xff]  }
  0xaf   :  { %1656 = vmatpush2.bf16.msra.mxu1 %v2375_v18  ;;  %1684 = vmatprep.subr.bf16.mxu0 %v2386_v21  ;;  %v2465_v18 = vld [vmem:[#allocation5 + $0x5e8] ss:$16 sps:$4 sm:$0xff]   ;;  %v2476_v21 = vld [vmem:[#allocation5 + $0x6cc] ss:$16 sps:$4 sm:$0xff]  }
  0xb0   :  { %1657 = vmatprep.subr.bf16.mxu1 %v2383_v20  ;;  %v2473_v20 = vld [vmem:[#allocation5 + $0x5cc] ss:$16 sps:$4 sm:$0xff]  }
  0xb2   :  { %1685 = vmatpush1.bf16.msra.mxu0 %v2384_v23  ;;  %v2474_v23 = vld [vmem:[#allocation5 + $0x6c8] ss:$16 sps:$4 sm:$0xff]  }
  0xb3   :  { %1658 = vmatpush2.bf16.msra.mxu1 %v2381_v22  ;;  %1686 = vmatprep.subr.bf16.mxu0 %v2392_v25  ;;  %v2471_v22 = vld [vmem:[#allocation5 + $0x5c8] ss:$16 sps:$4 sm:$0xff]   ;;  %v2482_v25 = vld [vmem:[#allocation5 + $0x6ac] ss:$16 sps:$4 sm:$0xff]  }
  0xb4   :  { %1659 = vmatprep.subr.bf16.mxu1 %v2389_v24  ;;  %v2479_v24 = vld [vmem:[#allocation5 + $0x5ac] ss:$16 sps:$4 sm:$0xff]  }
  0xb6   :  { %1687 = vmatpush1.bf16.msra.mxu0 %v2390_v27  ;;  %v2480_v27 = vld [vmem:[#allocation5 + $0x6a8] ss:$16 sps:$4 sm:$0xff]  }
  0xb7   :  { %1660 = vmatpush2.bf16.msra.mxu1 %v2387_v26  ;;  %1688 = vmatprep.subr.bf16.mxu0 %v2398_v29  ;;  %v2477_v26 = vld [vmem:[#allocation5 + $0x5a8] ss:$16 sps:$4 sm:$0xff]   ;;  %v2488_v29 = vld [vmem:[#allocation5 + $0x68c] ss:$16 sps:$4 sm:$0xff]  }
  0xb8   :  { %1661 = vmatprep.subr.bf16.mxu1 %v2395_v28  ;;  %v2485_v28 = vld [vmem:[#allocation5 + $0x58c] ss:$16 sps:$4 sm:$0xff]  }
  0xba   :  { %1689 = vmatpush1.bf16.msra.mxu0 %v2396_v51  ;;  %v2491_v51 = vld [vmem:[#allocation5 + $0x56c] ss:$16 sps:$4 sm:$0xff]  }
  0xbb   :  { %1662 = vmatpush2.bf16.msra.mxu1 %v2393_v30  ;;  %1690 = vmatprep.subr.bf16.mxu0 %v2404_v32  ;;  %v2486_v30 = vld [vmem:[#allocation5 + $0x688] ss:$16 sps:$4 sm:$0xff]  }
  0xbc   :  { %1663 = vmatprep.subr.bf16.mxu1 %v2401_v31  ;;  %v2494_v31 = vld [vmem:[#allocation5 + $0x66c] ss:$16 sps:$4 sm:$0xff]   ;;  %v2489_v32 = vld [vmem:[#allocation5 + $0x568] ss:$16 sps:$4 sm:$0xff]  }
  0xbe   :  { %1691 = vmatpush1.bf16.msra.mxu0 %v2402_v34  ;;  %v2500_v34 = vld [vmem:[#allocation5 + $0x64c] ss:$16 sps:$4 sm:$0xff]  }
  0xbf   :  { %1664 = vmatpush2.bf16.msra.mxu1 %v2399_v33  ;;  %1692 = vmatprep.subr.bf16.mxu0 %v2410_v37  ;;  %v2497_v33 = vld [vmem:[#allocation5 + $0x54c] ss:$16 sps:$4 sm:$0xff]   ;;  %v2498_v37 = vld [vmem:[#allocation5 + $0x648] ss:$16 sps:$4 sm:$0xff]  }
  0xc0   :  { %1665 = vmatprep.subr.bf16.mxu1 %v2407_v36  ;;  %v2495_v36 = vld [vmem:[#allocation5 + $0x548] ss:$16 sps:$4 sm:$0xff]  }
  0xc2   :  { %1693 = vmatpush1.bf16.msra.mxu0 %v2408_v39  ;;  %v2506_v39 = vld [vmem:[#allocation5 + $0x62c] ss:$16 sps:$4 sm:$0xff]  }
  0xc3   :  { %1666 = vmatpush2.bf16.msra.mxu1 %v2405_v38  ;;  %1694 = vmatprep.subr.bf16.mxu0 %v2416_v42  ;;  %v2503_v38 = vld [vmem:[#allocation5 + $0x52c] ss:$16 sps:$4 sm:$0xff]   ;;  %v2504_v42 = vld [vmem:[#allocation5 + $0x628] ss:$16 sps:$4 sm:$0xff]  }
  0xc4   :  { %1667 = vmatprep.subr.bf16.mxu1 %v2413_v40  ;;  %v2501_v40 = vld [vmem:[#allocation5 + $0x528] ss:$16 sps:$4 sm:$0xff]  }
  0xc6   :  { %1695 = vmatpush1.bf16.msra.mxu0 %v2414_v44  ;;  %v2512_v44 = vld [vmem:[#allocation5 + $0x60c] ss:$16 sps:$4 sm:$0xff]  }
  0xc7   :  { %1668 = vmatpush2.bf16.msra.mxu1 %v2411_v43  ;;  %1696 = vmatprep.subr.bf16.mxu0 %v2419_v45  ;;  %v2509_v43 = vld [vmem:[#allocation5 + $0x50c] ss:$16 sps:$4 sm:$0xff]   ;;  %v2507_v45 = vld [vmem:[#allocation5 + $0x508] ss:$16 sps:$4 sm:$0xff]  }
  0xc8   :  { %1723 = vmatprep.subr.bf16.mxu1 %v2422_v46  ;;  %v2510_v46 = vld [vmem:[#allocation5 + $0x608] ss:$16 sps:$4 sm:$0xff]  }
  0xca   :  { %1670 = vmatmul.mubr.bf16.vlgmr.msra.gmra.mxu1 %v2678_v4  ;;  %1697 = vmatpush2.bf16.msra.mxu0 %v2417_v47  ;;  %v2435_v4 = vld [vmem:[#allocation5 + $0x388] ss:$16 sps:$4 sm:$0xff]   ;;  %v289_v47 = vlaneseq }
  0xcb   :  { %1724 = vmatpush1.bf16.msra.mxu1 %v2420_v48  ;;  %1698 = vmatprep.subr.bf16.mxu0 %v2425_v50 }
  0xcc   :  { %1725 = vmatprep.subr.bf16.mxu1 %v2428_v52  ;;  %1755 = vmatprep.mubr.bf16.mxu1 %v2685_v35  ;;  %v2444_v35 = vld [vmem:[#allocation5 + $0x468] ss:$16 sps:$4 sm:$0xff]   ;;  %v2702_v50 = vshrl.u32 %v289_v47, 7 }
  0xce   :  { %1699 = vmatpush2.bf16.msra.mxu0 %v2423_v53 }
  0xcf   :  { %1726 = vmatpush1.bf16.msra.mxu1 %v2426_v54  ;;  %1700 = vmatprep.subr.bf16.mxu0 %v2431_v55  ;;  %v291_v54 = vsub.s32 0, %v2702_v50  ;;  %v2705_v55 = vld [vmem:[#allocation7] sm:$0xf] }
  0xd0   :  { %1727 = vmatprep.subr.bf16.mxu1 %v2434_v56  ;;  %v295_v56 = vsub.s32 1, %v2702_v50 }
  0xd2   :  { %1701 = vmatpush2.bf16.msra.mxu0 %v2429_v57 }
  0xd3   :  { %1728 = vmatpush1.bf16.msra.mxu1 %v2432_v58  ;;  %1702 = vmatprep.subr.bf16.mxu0 %v2437_v59  ;;  %v292_v59 = vrot.slane %v2705_v55, %v291_v54 }
  0xd4   :  { %1729 = vmatprep.subr.bf16.mxu1 %v2440_v49 }
  0xd6   :  { %1703 = vmatpush2.bf16.msra.mxu0 %v2435_v4 }
  0xd7   :  { %1730 = vmatpush1.bf16.msra.mxu1 %v2438_v60  ;;  %1704 = vmatprep.subr.bf16.mxu0 %v2443_v61 }
  0xd8   :  { %1731 = vmatprep.subr.bf16.mxu1 %v2446_v62 }
  0xda   :  { %1705 = vmatpush2.bf16.msra.mxu0 %v2441_v63 }
  0xdb   :  { %1732 = vmatpush1.bf16.msra.mxu1 %v2444_v35  ;;  %1706 = vmatprep.subr.bf16.mxu0 %v2449_v0 }
  0xdc   :  { %1733 = vmatprep.subr.bf16.mxu1 %v2452_v1 }
  0xde   :  { %1707 = vmatpush2.bf16.msra.mxu0 %v2447_v2 }
  0xdf   :  { %1734 = vmatpush1.bf16.msra.mxu1 %v2450_v3  ;;  %1708 = vmatprep.subr.bf16.mxu0 %v2455_v6 }
  0xe0   :  { %1735 = vmatprep.subr.bf16.mxu1 %v2458_v7 }
  0xe2   :  { %1709 = vmatpush2.bf16.msra.mxu0 %v2453_v8 }
  0xe3   :  { %1736 = vmatpush1.bf16.msra.mxu1 %v2456_v9  ;;  %1710 = vmatprep.subr.bf16.mxu0 %v2461_v10 }
  0xe4   :  { %1737 = vmatprep.subr.bf16.mxu1 %v2464_v11 }
  0xe6   :  { %1711 = vmatpush2.bf16.msra.mxu0 %v2459_v13 }
  0xe7   :  { %1738 = vmatpush1.bf16.msra.mxu1 %v2462_v15  ;;  %1766 = vmatprep.subr.bf16.mxu0 %v2470_v17 }
  0xe8   :  { %1739 = vmatprep.subr.bf16.mxu1 %v2467_v16 }
  0xe9   :  { %1713 = vmatmul.mubr.bf16.vlgmr.msra.gmra.mxu0 %v2680_v5  ;;  %v2483_v5 = vld [vmem:[#allocation5 + $0x588] ss:$16 sps:$4 sm:$0xff]  }
  0xea   :  { %1767 = vmatpush1.bf16.msra.mxu0 %v2468_v19  ;;  %1798 = vmatprep.mubr.bf16.mxu0 %v2638_v14  ;;  %v2492_v14 = vld [vmem:[#allocation5 + $0x668] ss:$16 sps:$4 sm:$0xff]  }
  0xeb   :  { %1740 = vmatpush2.bf16.msra.mxu1 %v2465_v18  ;;  %1768 = vmatprep.subr.bf16.mxu0 %v2476_v21 }
  0xec   :  { %1741 = vmatprep.subr.bf16.mxu1 %v2473_v20 }
  0xee   :  { %1769 = vmatpush1.bf16.msra.mxu0 %v2474_v23 }
  0xef   :  { %1742 = vmatpush2.bf16.msra.mxu1 %v2471_v22  ;;  %1770 = vmatprep.subr.bf16.mxu0 %v2482_v25 }
  0xf0   :  { %1743 = vmatprep.subr.bf16.mxu1 %v2479_v24 }
  0xf2   :  { %1771 = vmatpush1.bf16.msra.mxu0 %v2480_v27 }
  0xf3   :  { %1744 = vmatpush2.bf16.msra.mxu1 %v2477_v26  ;;  %1772 = vmatprep.subr.bf16.mxu0 %v2488_v29 }
  0xf4   :  { %1745 = vmatprep.subr.bf16.mxu1 %v2485_v28 }
  0xf6   :  { %1773 = vmatpush1.bf16.msra.mxu0 %v2486_v30 }
  0xf7   :  { %1746 = vmatpush2.bf16.msra.mxu1 %v2483_v5  ;;  %1774 = vmatprep.subr.bf16.mxu0 %v2494_v31 }
  0xf8   :  { %1747 = vmatprep.subr.bf16.mxu1 %v2491_v51 }
  0xfa   :  { %1775 = vmatpush1.bf16.msra.mxu0 %v2492_v14 }
  0xfb   :  { %1748 = vmatpush2.bf16.msra.mxu1 %v2489_v32  ;;  %1776 = vmatprep.subr.bf16.mxu0 %v2500_v34 }
  0xfc   :  { %1749 = vmatprep.subr.bf16.mxu1 %v2497_v33 }
  0xfe   :  { %1777 = vmatpush1.bf16.msra.mxu0 %v2498_v37 }
  0xff   :  { %1750 = vmatpush2.bf16.msra.mxu1 %v2495_v36  ;;  %1778 = vmatprep.subr.bf16.mxu0 %v2506_v39 }
 0x100   :  { %1751 = vmatprep.subr.bf16.mxu1 %v2503_v38 }
 0x102   :  { %1779 = vmatpush1.bf16.msra.mxu0 %v2504_v42 }
 0x103   :  { %1752 = vmatpush2.bf16.msra.mxu1 %v2501_v40  ;;  %1780 = vmatprep.subr.bf16.mxu0 %v2512_v44 }
 0x104   :  { %1753 = vmatprep.subr.bf16.mxu1 %v2509_v43 }
 0x106   :  { %1781 = vmatpush1.bf16.msra.mxu0 %v2510_v46  ;;  %v299_v46 = vsub.s32 2, %v2702_v50 }
 0x107   :  { %1754 = vmatpush2.bf16.msra.mxu1 %v2507_v45 }
 0x109   :  { %1799 = vmatmul.mubr.bf16.vlgmr.msra.gmra.mxu0 %v2688_v41 }
 0x10a   :  { %1756 = vmatmul.mubr.bf16.vlgmr.msra.gmra.mxu1 %v2692_v12  ;;  %v296_v12 = vrot.slane %v2705_v55, %v295_v56 }
 0x129   :  { %v1499_v52 = vpop.f32.mrf.mxu0 }
 0x12a   :  { %v1542_v48 = vpop.f32.mrf.mxu1  ;;  %v1500_v4 = vadd.f32 %v1499_v52, %v292_v59  ;;  %v303_v52 = vsub.s32 3, %v2702_v50 }
 0x12b   :  { %v1501_v57 = vpop.f32.mrf.mxu0 }
 0x12c   :  { %v1544_v53 = vpop.f32.mrf.mxu1  ;;  %v1502_v61 = vadd.f32 %v1501_v57, %v296_v12  ;;  %v1543_v63 = vadd.f32 %v1542_v48, %v1500_v4  ;;  %v304_v57 = vrot.slane %v2705_v55, %v303_v52 }
 0x12d   :  { %v1503_v49 = vpop.f32.mrf.mxu0 }
 0x12e   :  { %v1546_v58 = vpop.f32.mrf.mxu1  ;;  %v1504_v35 = vadd.f32 %v1503_v49, %v292_v59  ;;  %v1545_v2 = vadd.f32 %v1544_v53, %v1502_v61  ;;  %v300_v53 = vrot.slane %v2705_v55, %v299_v46 }
 0x12f   :  { %v1505_v62 = vpop.f32.mrf.mxu0 }
 0x130   :  { %v1548_v41 = vpop.f32.mrf.mxu1  ;;  %v1506_v3 = vadd.f32 %v1505_v62, %v296_v12  ;;  %v1547_v8 = vadd.f32 %v1546_v58, %v1504_v35 }
 0x132   :  { %v1549_v15 = vadd.f32 %v1548_v41, %v1506_v3 }
 0x14a   :  { %v1628_v60 = vpop.f32.mrf.mxu1 }
 0x14c   :  { %v1630_v0 = vpop.f32.mrf.mxu1 }
 0x14e   :  { %v1632_v11 = vpop.f32.mrf.mxu1 }
 0x150   :  { %v1634_v23 = vpop.f32.mrf.mxu1 }
 0x169   :  { %v1585_v1 = vpop.f32.mrf.mxu0 }
 0x16a   :  { %v1586_v6 = vadd.f32 %v1585_v1, %v1543_v63 }
 0x16b   :  { %v1587_v7 = vpop.f32.mrf.mxu0 }
 0x16c   :  { %v1629_v9 = vadd.f32 %v1628_v60, %v1586_v6  ;;  %v1588_v10 = vadd.f32 %v1587_v7, %v1545_v2 }
 0x16d   :  { %v1589_v13 = vpop.f32.mrf.mxu0 }
 0x16e   :  { %v2142_v16 = vmul.f32 -1.442695, %v1629_v9  ;;  %v1631_v17 = vadd.f32 %v1630_v0, %v1588_v10  ;;  %v1590_v18 = vadd.f32 %v1589_v13, %v1547_v8 }
 0x16f   :  { %v1591_v19 = vpop.f32.mrf.mxu0 }
 0x170   :  { %2513 = vpow2.f32 %v2142_v16  ;;  %v2143_v20 = vmul.f32 -1.442695, %v1631_v17  ;;  %v1633_v21 = vadd.f32 %v1632_v11, %v1590_v18  ;;  %v1592_v22 = vadd.f32 %v1591_v19, %v1549_v15 }
 0x172   :  { %2515 = vpow2.f32 %v2143_v20  ;;  %v2146_v24 = vmul.f32 -1.442695, %v1633_v21  ;;  %v1635_v25 = vadd.f32 %v1634_v23, %v1592_v22 }
 0x174   :  { %2517 = vpow2.f32 %v2146_v24  ;;  %v2147_v26 = vmul.f32 -1.442695, %v1635_v25 }
 0x176   :  { %2519 = vpow2.f32 %v2147_v26 }
 0x17d   :  { %v2514_v27 = vpop.eup %2513 }
 0x17e   :  { %v1833_v28 = vadd.f32 1.0, %v2514_v27 }
 0x17f   :  { %v2516_v29 = vpop.eup %2515 }
 0x180   :  { %2521 = vrcp.f32 %v1833_v28  ;;  %v1834_v5 = vadd.f32 1.0, %v2516_v29 }
 0x181   :  { %v2518_v30 = vpop.eup %2517 }
 0x182   :  { %2523 = vrcp.f32 %v1834_v5  ;;  %v1837_v51 = vadd.f32 1.0, %v2518_v30 }
 0x183   :  { %v2520_v31 = vpop.eup %2519 }
 0x184   :  { %2525 = vrcp.f32 %v1837_v51  ;;  %v1838_v32 = vadd.f32 1.0, %v2520_v31 }
 0x186   :  { %2527 = vrcp.f32 %v1838_v32 }
 0x18a   :  { %v1671_v44 = vpop.f32.mrf.mxu1 }
 0x18b   :  { %v1672_v58 = vadd.f32 %v1671_v44, %v300_v53 }
 0x18c   :  { %v1673_v47 = vpop.f32.mrf.mxu1 }
 0x18d   :  { %v2522_v14 = vpop.eup %2521  ;;  %v1674_v49 = vadd.f32 %v1673_v47, %v304_v57 }
 0x18e   :  { %v1857_v34 = vmul.f32 %v2522_v14, %v1629_v9  ;;  %v1675_v54 = vpop.f32.mrf.mxu1 }
 0x18f   :  { %v2524_v33 = vpop.eup %2523  ;;  %v1676_v61 = vadd.f32 %v1675_v54, %v300_v53 }
 0x190   :  { %v1858_v36 = vmul.f32 %v2524_v33, %v1631_v17  ;;  %v1677_v59 = vpop.f32.mrf.mxu1 }
 0x191   :  { %v2526_v37 = vpop.eup %2525  ;;  %v1678_v1 = vadd.f32 %v1677_v59, %v304_v57 }
 0x192   :  { %v2154_v38 = vpack.c.bf16 %v1858_v36, %v1857_v34  ;;  %v1861_v40 = vmul.f32 %v2526_v37, %v1633_v21 }
 0x193   :  { %v2528_v39 = vpop.eup %2527 }
 0x194   :  { %1889 = vst [vmem:[#allocation8] sm:$0xff] %v2154_v38  ;;  %v1862_v42 = vmul.f32 %v2528_v39, %v1635_v25 }
 0x196   :  { %v2156_v43 = vpack.c.bf16 %v1862_v42, %v1861_v40 }
 0x198   :  { %1891 = vst [vmem:[#allocation8 + $0x10] sm:$0xff] %v2156_v43 }
 0x1a9   :  { %v1714_v45 = vpop.f32.mrf.mxu0 }
 0x1aa   :  { %v1715_v41 = vadd.f32 %v1714_v45, %v1672_v58 }
 0x1ab   :  { %v1716_v48 = vpop.f32.mrf.mxu0 }
 0x1ac   :  { %v1717_v62 = vadd.f32 %v1716_v48, %v1674_v49 }
 0x1ad   :  { %v1718_v56 = vpop.f32.mrf.mxu0 }
 0x1ae   :  { %v1719_v50 = vadd.f32 %v1718_v56, %v1676_v61 }
 0x1af   :  { %v1720_v12 = vpop.f32.mrf.mxu0 }
 0x1b0   :  { %v1721_v8 = vadd.f32 %v1720_v12, %v1678_v1 }
 0x1c9   :  { %v1800_v60 = vpop.f32.mrf.mxu0 }
 0x1ca   :  { %v1757_v4 = vpop.f32.mrf.mxu1 }
 0x1cb   :  { %v1758_v63 = vadd.f32 %v1757_v4, %v1715_v41  ;;  %v1802_v0 = vpop.f32.mrf.mxu0 }
 0x1cc   :  { %v1759_v35 = vpop.f32.mrf.mxu1 }
 0x1cd   :  { %v1801_v2 = vadd.f32 %v1800_v60, %v1758_v63  ;;  %v1760_v3 = vadd.f32 %v1759_v35, %v1717_v62  ;;  %v1804_v7 = vpop.f32.mrf.mxu0 }
 0x1ce   :  { %v1761_v6 = vpop.f32.mrf.mxu1 }
 0x1cf   :  { %v2144_v55 = vmul.f32 -1.442695, %v1801_v2  ;;  %v1803_v9 = vadd.f32 %v1802_v0, %v1760_v3  ;;  %v1762_v10 = vadd.f32 %v1761_v6, %v1719_v50  ;;  %v1806_v17 = vpop.f32.mrf.mxu0 }
 0x1d0   :  { %v1763_v11 = vpop.f32.mrf.mxu1 }
 0x1d1   :  { %2529 = vpow2.f32 %v2144_v55  ;;  %v2145_v13 = vmul.f32 -1.442695, %v1803_v9  ;;  %v1805_v15 = vadd.f32 %v1804_v7, %v1762_v10  ;;  %v1764_v16 = vadd.f32 %v1763_v11, %v1721_v8 }
 0x1d3   :  { %2531 = vpow2.f32 %v2145_v13  ;;  %v2148_v18 = vmul.f32 -1.442695, %v1805_v15  ;;  %v1807_v19 = vadd.f32 %v1806_v17, %v1764_v16 }
 0x1d5   :  { %2533 = vpow2.f32 %v2148_v18  ;;  %v2149_v20 = vmul.f32 -1.442695, %v1807_v19 }
 0x1d7   :  { %2535 = vpow2.f32 %v2149_v20 }
 0x1de   :  { %v2530_v21 = vpop.eup %2529 }
 0x1df   :  { %v1835_v22 = vadd.f32 1.0, %v2530_v21 }
 0x1e0   :  { %v2532_v23 = vpop.eup %2531 }
 0x1e1   :  { %2537 = vrcp.f32 %v1835_v22  ;;  %v1836_v24 = vadd.f32 1.0, %v2532_v23 }
 0x1e2   :  { %v2534_v25 = vpop.eup %2533 }
 0x1e3   :  { %2539 = vrcp.f32 %v1836_v24  ;;  %v1839_v26 = vadd.f32 1.0, %v2534_v25 }
 0x1e4   :  { %v2536_v27 = vpop.eup %2535 }
 0x1e5   :  { %2541 = vrcp.f32 %v1839_v26  ;;  %v1840_v28 = vadd.f32 1.0, %v2536_v27 }
 0x1e7   :  { %2543 = vrcp.f32 %v1840_v28 }
 0x1ee   :  { %v2538_v29 = vpop.eup %2537 }
 0x1ef   :  { %v1859_v30 = vmul.f32 %v2538_v29, %v1801_v2 }
 0x1f0   :  { %v2540_v5 = vpop.eup %2539 }
 0x1f1   :  { %v1860_v51 = vmul.f32 %v2540_v5, %v1803_v9 }
 0x1f2   :  { %v2542_v31 = vpop.eup %2541 }
 0x1f3   :  { %v2155_v32 = vpack.c.bf16 %v1860_v51, %v1859_v30  ;;  %v1863_v33 = vmul.f32 %v2542_v31, %v1805_v15 }
 0x1f4   :  { %v2544_v14 = vpop.eup %2543 }
 0x1f5   :  { %1890 = vst [vmem:[#allocation8 + $0x8] sm:$0xff] %v2155_v32  ;;  %v1864_v34 = vmul.f32 %v2544_v14, %v1807_v19 }
 0x1f7   :  { %v2157_v36 = vpack.c.bf16 %v1864_v34, %v1863_v33 }
 0x1f9   :  { %1892 = vst [vmem:[#allocation8 + $0x18] sm:$0xff] %v2157_v36 }
 0x1fa   :  { %2616 = shalt.err (!%p2613_p5)
}
 0x1fb   :  { %1904 = dma.vmem_to_hbm [thread:$0]  %s1899_s2, 512, %s2723_s3, [#allocation4], %s2632_s15, %s2632_s15, %s2633_s16  }
 0x1fc   :  { %2629 = dma.done.wait [#allocation4], 512  }
 0x1fd   :  { %2630 = vsyncadd [#allocation4], 4294966784 }
 0x1fe   :  { %1908 = vsyncpa [#allocation3], 1 }
 0x1ff   :  { %1909 = vsyncpa [#allocation6], 1 }
 0x200   :  { %1910 = vsyncpa [#allocation4], 1 }

</bundles_post_ra>
